<compile_context>
chip_gen: v7x
topology: tpu7x:2x2x1
jax: 0.10.0
libtpu: 0.0.40
codegen_flags: <defaults>
</compile_context>

<pallas_src>
import math
import jax
import jax.numpy as jnp
from jax.experimental import pallas as pl
from jax.experimental.pallas import tpu as pltpu


def make_mlp_kernel(num_layers, compute_dtype):
    """Kernel for a fixed number of Linear layers, batch-on-lanes layout.

    Ref order: (x_ref, w0, b0, ..., w_{L-1}, b_{L-1}, o_ref)
      x_ref : (in_dim, tb)    activations, batch on the lane axis
      w_i   : (out_i, in_i)   PyTorch weight layout, compute_dtype (bf16)
      b_i   : (out_i, 1)      float32
      o_ref : (out_dim, tb)   float32, lane-dense output slab
    """
    def kernel(*refs):
        x_ref, o_ref = refs[0], refs[-1]
        params = refs[1:-1]
        h = x_ref[...].astype(compute_dtype)                         # (in, tb)
        for li in range(num_layers):
            w = params[2 * li][...]                                  # (out, in)  bf16
            b = params[2 * li + 1][...]                              # (out, 1)   f32
            acc = jnp.dot(w, h, preferred_element_type=jnp.float32)  # MXU, f32 accum
            acc = acc + b                                            # bias add in f32 (VPU)
            if li < num_layers - 1:
                h = jnp.maximum(acc, 0.0).astype(compute_dtype)      # ReLU in f32, repack bf16
            else:
                h = acc                                              # final layer stays f32
        o_ref[...] = h.astype(o_ref.dtype)
    return kernel


def _pick_batch_tile(batch_padded):
    # Largest lane-aligned (multiple of 128) tile that still leaves >= 2 grid steps
    # (keeps both v7x TensorCores busy); otherwise take the whole batch as one block
    # (full-extent blocks are always layout-legal).
    for cand in (1024, 512, 256, 128):
        if batch_padded % cand == 0 and batch_padded // cand >= 2:
            return cand
    return batch_padded


def mlp_forward(x, weights, biases, *, tb=None, compute_dtype=jnp.bfloat16):
    """x: (B, in_dim). weights[i]: (out_i, in_i). biases[i]: (out_i, 1). Returns (B, out_dim) f32."""
    B, in_dim = x.shape
    num_layers = len(weights)
    out_dim = weights[-1].shape[0]

    # Pad ragged batches up to a lane multiple so every tile is lane-dense.
    if B >= 128 and B % 128 != 0:
        B_pad = ((B + 127) // 128) * 128
    else:
        B_pad = B
    if tb is None:
        tb = _pick_batch_tile(B_pad)
    assert B_pad % tb == 0, "padded batch must be divisible by the batch tile"
    assert tb == B_pad or tb % 128 == 0, "batch tile must be lane-aligned (x128) or full batch"

    x_t = x.T                                           # (in_dim, B): batch on lanes
    if B_pad != B:
        x_t = jnp.pad(x_t, ((0, 0), (0, B_pad - B)))
    w_c = [w.astype(compute_dtype) for w in weights]
    b_c = [b.astype(jnp.float32) for b in biases]

    kernel = make_mlp_kernel(num_layers, compute_dtype)

    in_specs = [pl.BlockSpec((in_dim, tb), lambda i: (0, i))]
    flat_params = []
    for w, b in zip(w_c, b_c):
        # Weights/biases are whole-array, grid-invariant blocks (constant index_map ->
        # not re-fetched between consecutive grid steps).
        # TODO(synk): for hidden widths >~1024 on v7x (64 MiB VMEM), tile the weight
        #             in/out dims with a reduction grid axis (or manually DMA them once)
        #             instead of keeping every layer resident + double-buffered.
        in_specs.append(pl.BlockSpec(w.shape, lambda i: (0, 0)))
        in_specs.append(pl.BlockSpec(b.shape, lambda i: (0, 0)))
        flat_params += [w, b]

    out_specs = pl.BlockSpec((out_dim, tb), lambda i: (0, i))   # lane-dense output block

    # Scheduler hint: flops / bytes of the fused MLP.
    flops = 2 * B_pad * sum(int(w.shape[0]) * int(w.shape[1]) for w in w_c)
    bytes_accessed = (int(x_t.size) * x_t.dtype.itemsize
                      + sum(int(a.size) * a.dtype.itemsize for a in flat_params)
                      + B_pad * out_dim * 4)
    cost = pl.CostEstimate(flops=flops, transcendentals=0,
                           bytes_accessed=bytes_accessed)

    # Explicit VMEM budget: all params + one input/output tile, double-buffered, + headroom.
    param_bytes = sum(int(a.size) * a.dtype.itemsize for a in flat_params)
    tile_bytes = in_dim * tb * x_t.dtype.itemsize + out_dim * tb * 4
    vmem_limit = int(min(max(2 * (param_bytes + tile_bytes) + (1 << 20), 32 << 20), 64 << 20))

    out_t = pl.pallas_call(
        kernel,
        out_shape=jax.ShapeDtypeStruct((out_dim, B_pad), jnp.float32),
        grid=(B_pad // tb,),
        in_specs=in_specs,
        out_specs=out_specs,
        compiler_params=pltpu.CompilerParams(
            dimension_semantics=("parallel",),
            vmem_limit_bytes=vmem_limit),
        cost_estimate=cost,
    )(x_t, *flat_params)

    out = out_t.T                                       # (B_pad, out_dim)
    if B_pad != B:
        out = out[:B]
    return out                                          # (B, out_dim), matches PyTorch


def init_params(key, input_dim, hidden_layer_width, depth, output_dim=1,
                weight_dtype=jnp.bfloat16):
    """Kaiming-uniform (nonlinearity='relu') weights, zero biases.

    PyTorch: bound = gain * sqrt(3 / fan_in), gain = sqrt(2) for 'relu'.
    Weights are kept in PyTorch (out_features, in_features) layout; biases are (out, 1).
    """
    dims = [input_dim] + [hidden_layer_width] * depth + [output_dim]
    weights, biases = [], []
    for li in range(len(dims) - 1):
        fan_in, fan_out = dims[li], dims[li + 1]
        key, sub = jax.random.split(key)
        bound = math.sqrt(2.0) * math.sqrt(3.0 / fan_in)
        w = jax.random.uniform(sub, (fan_out, fan_in), jnp.float32,
                               minval=-bound, maxval=bound).astype(weight_dtype)
        b = jnp.zeros((fan_out, 1), jnp.float32)
        weights.append(w)
        biases.append(b)
    return weights, biases


def reference_forward(x, weights, biases, compute_dtype=jnp.bfloat16):
    """Pure-JAX reference mirroring the kernel math (bf16 matmuls, f32 accumulate/bias/ReLU)."""
    h = x.T.astype(compute_dtype)
    for li, (w, b) in enumerate(zip(weights, biases)):
        acc = jnp.dot(w.astype(compute_dtype), h,
                      preferred_element_type=jnp.float32) + b.astype(jnp.float32)
        if li < len(weights) - 1:
            h = jnp.maximum(acc, 0.0).astype(compute_dtype)
        else:
            h = acc
    return h.T


if __name__ == "__main__":
    # config = {'input_dim': 16, 'hidden_layer_width': 32, 'depth': 3}
    config = dict(input_dim=16, hidden_layer_width=32, depth=3)
    batch = 256   # -> tb=128, grid=(2,) "parallel": lane-aligned tiles, both v7x TCs busy

    key = jax.random.PRNGKey(0)
    key, xkey = jax.random.split(key)
    x = jax.random.normal(xkey, (batch, config["input_dim"]), jnp.float32)

    weights, biases = init_params(
        key, config["input_dim"], config["hidden_layer_width"], config["depth"])

    out = mlp_forward(x, weights, biases)
    out = jax.block_until_ready(out)

    ref = reference_forward(x, weights, biases)
    assert out.shape == (batch, 1), out.shape
    assert jnp.allclose(out, ref, atol=1e-4, rtol=1e-4), \
        float(jnp.max(jnp.abs(out - ref)))

    print("KERNEL_OK")
</pallas_src>

<mosaic_0001>
module attributes {stable_mosaic.version = 11 : i64} {
  func.func @kernel(%arg0: i32, %arg1: memref<16x128xf32, #tpu.memory_space<vmem>>, %arg2: memref<32x16xbf16, #tpu.memory_space<vmem>>, %arg3: memref<32x1xf32, #tpu.memory_space<vmem>>, %arg4: memref<32x32xbf16, #tpu.memory_space<vmem>>, %arg5: memref<32x1xf32, #tpu.memory_space<vmem>>, %arg6: memref<32x32xbf16, #tpu.memory_space<vmem>>, %arg7: memref<32x1xf32, #tpu.memory_space<vmem>>, %arg8: memref<1x32xbf16, #tpu.memory_space<vmem>>, %arg9: memref<1x1xf32, #tpu.memory_space<vmem>>, %arg10: memref<1x128xf32, #tpu.memory_space<vmem>>) attributes {dimension_semantics = [#tpu.dimension_semantics<parallel>], iteration_bounds = array<i64: 2>, scalar_prefetch = 0 : i64, scratch_operands = 0 : i64, tpu.core_type = #tpu.core_type<tc>, window_params = [{transform_indices = @transform_0, window_bounds = array<i64: 16, 128>}, {pipeline_mode = #tpu.pipeline_mode<synchronous>, transform_indices = @transform_1, window_bounds = array<i64: 32, 16>}, {pipeline_mode = #tpu.pipeline_mode<synchronous>, transform_indices = @transform_2, window_bounds = array<i64: 32, 1>}, {pipeline_mode = #tpu.pipeline_mode<synchronous>, transform_indices = @transform_3, window_bounds = array<i64: 32, 32>}, {pipeline_mode = #tpu.pipeline_mode<synchronous>, transform_indices = @transform_4, window_bounds = array<i64: 32, 1>}, {pipeline_mode = #tpu.pipeline_mode<synchronous>, transform_indices = @transform_5, window_bounds = array<i64: 32, 32>}, {pipeline_mode = #tpu.pipeline_mode<synchronous>, transform_indices = @transform_6, window_bounds = array<i64: 32, 1>}, {pipeline_mode = #tpu.pipeline_mode<synchronous>, transform_indices = @transform_7, window_bounds = array<i64: 1, 32>}, {pipeline_mode = #tpu.pipeline_mode<synchronous>, transform_indices = @transform_8, window_bounds = array<i64: 1, 1>}, {transform_indices = @transform_9, window_bounds = array<i64: 1, 128>}]} {
    %c0 = arith.constant 0 : index
    %c0_0 = arith.constant 0 : index
    %0 = vector.load %arg1[%c0, %c0_0] : memref<16x128xf32, #tpu.memory_space<vmem>>, vector<16x128xf32>
    %1 = arith.truncf %0 : vector<16x128xf32> to vector<16x128xbf16>
    %c0_1 = arith.constant 0 : index
    %c0_2 = arith.constant 0 : index
    %2 = vector.load %arg2[%c0_1, %c0_2] : memref<32x16xbf16, #tpu.memory_space<vmem>>, vector<32x16xbf16>
    %c0_3 = arith.constant 0 : index
    %c0_4 = arith.constant 0 : index
    %3 = vector.load %arg3[%c0_3, %c0_4] : memref<32x1xf32, #tpu.memory_space<vmem>>, vector<32x1xf32>
    %cst = arith.constant dense<0.000000e+00> : vector<32x128xf32>
    %4 = tpu.matmul %2, %1, %cst {dimension_numbers = #tpu.dot_dimension_numbers<[1], [0], [0], [1], [0, 0, 1, 1], [], []>} : vector<32x16xbf16>, vector<16x128xbf16>, vector<32x128xf32> -> vector<32x128xf32>
    %5 = vector.broadcast %3 : vector<32x1xf32> to vector<32x128xf32>
    %6 = arith.addf %4, %5 : vector<32x128xf32>
    %cst_5 = arith.constant 0.000000e+00 : f32
    %7 = vector.broadcast %cst_5 : f32 to vector<32x128xf32>
    %8 = arith.maximumf %6, %7 : vector<32x128xf32>
    %9 = arith.truncf %8 : vector<32x128xf32> to vector<32x128xbf16>
    %c0_6 = arith.constant 0 : index
    %c0_7 = arith.constant 0 : index
    %10 = vector.load %arg4[%c0_6, %c0_7] : memref<32x32xbf16, #tpu.memory_space<vmem>>, vector<32x32xbf16>
    %c0_8 = arith.constant 0 : index
    %c0_9 = arith.constant 0 : index
    %11 = vector.load %arg5[%c0_8, %c0_9] : memref<32x1xf32, #tpu.memory_space<vmem>>, vector<32x1xf32>
    %cst_10 = arith.constant dense<0.000000e+00> : vector<32x128xf32>
    %12 = tpu.matmul %10, %9, %cst_10 {dimension_numbers = #tpu.dot_dimension_numbers<[1], [0], [0], [1], [0, 0, 1, 1], [], []>} : vector<32x32xbf16>, vector<32x128xbf16>, vector<32x128xf32> -> vector<32x128xf32>
    %13 = vector.broadcast %11 : vector<32x1xf32> to vector<32x128xf32>
    %14 = arith.addf %12, %13 : vector<32x128xf32>
    %cst_11 = arith.constant 0.000000e+00 : f32
    %15 = vector.broadcast %cst_11 : f32 to vector<32x128xf32>
    %16 = arith.maximumf %14, %15 : vector<32x128xf32>
    %17 = arith.truncf %16 : vector<32x128xf32> to vector<32x128xbf16>
    %c0_12 = arith.constant 0 : index
    %c0_13 = arith.constant 0 : index
    %18 = vector.load %arg6[%c0_12, %c0_13] : memref<32x32xbf16, #tpu.memory_space<vmem>>, vector<32x32xbf16>
    %c0_14 = arith.constant 0 : index
    %c0_15 = arith.constant 0 : index
    %19 = vector.load %arg7[%c0_14, %c0_15] : memref<32x1xf32, #tpu.memory_space<vmem>>, vector<32x1xf32>
    %cst_16 = arith.constant dense<0.000000e+00> : vector<32x128xf32>
    %20 = tpu.matmul %18, %17, %cst_16 {dimension_numbers = #tpu.dot_dimension_numbers<[1], [0], [0], [1], [0, 0, 1, 1], [], []>} : vector<32x32xbf16>, vector<32x128xbf16>, vector<32x128xf32> -> vector<32x128xf32>
    %21 = vector.broadcast %19 : vector<32x1xf32> to vector<32x128xf32>
    %22 = arith.addf %20, %21 : vector<32x128xf32>
    %cst_17 = arith.constant 0.000000e+00 : f32
    %23 = vector.broadcast %cst_17 : f32 to vector<32x128xf32>
    %24 = arith.maximumf %22, %23 : vector<32x128xf32>
    %25 = arith.truncf %24 : vector<32x128xf32> to vector<32x128xbf16>
    %c0_18 = arith.constant 0 : index
    %c0_19 = arith.constant 0 : index
    %26 = vector.load %arg8[%c0_18, %c0_19] : memref<1x32xbf16, #tpu.memory_space<vmem>>, vector<1x32xbf16>
    %c0_20 = arith.constant 0 : index
    %c0_21 = arith.constant 0 : index
    %27 = vector.load %arg9[%c0_20, %c0_21] : memref<1x1xf32, #tpu.memory_space<vmem>>, vector<1x1xf32>
    %cst_22 = arith.constant dense<0.000000e+00> : vector<1x128xf32>
    %28 = tpu.matmul %26, %25, %cst_22 {dimension_numbers = #tpu.dot_dimension_numbers<[1], [0], [0], [1], [0, 0, 1, 1], [], []>} : vector<1x32xbf16>, vector<32x128xbf16>, vector<1x128xf32> -> vector<1x128xf32>
    %29 = vector.broadcast %27 : vector<1x1xf32> to vector<1x128xf32>
    %30 = arith.addf %28, %29 : vector<1x128xf32>
    %c0_23 = arith.constant 0 : index
    %c0_24 = arith.constant 0 : index
    %31 = vector.load %arg10[%c0_23, %c0_24] : memref<1x128xf32, #tpu.memory_space<vmem>>, vector<1x128xf32>
    tpu.vector_store %arg10[%c0_23, %c0_24], %30 {strides = array<i32>} : memref<1x128xf32, #tpu.memory_space<vmem>>, vector<1x128xf32>,
    return
  }
  func.func @transform_0(%arg0: i32) -> (i32, i32) {
    %c0_i32 = arith.constant 0 : i32
    %c0_i32_0 = arith.constant 0 : i32
    return %c0_i32, %arg0 : i32, i32
  }
  func.func @transform_1(%arg0: i32) -> (i32, i32) {
    %c0_i32 = arith.constant 0 : i32
    %c0_i32_0 = arith.constant 0 : i32
    %c0_i32_1 = arith.constant 0 : i32
    return %c0_i32, %c0_i32_0 : i32, i32
  }
  func.func @transform_2(%arg0: i32) -> (i32, i32) {
    %c0_i32 = arith.constant 0 : i32
    %c0_i32_0 = arith.constant 0 : i32
    %c0_i32_1 = arith.constant 0 : i32
    return %c0_i32, %c0_i32_0 : i32, i32
  }
  func.func @transform_3(%arg0: i32) -> (i32, i32) {
    %c0_i32 = arith.constant 0 : i32
    %c0_i32_0 = arith.constant 0 : i32
    %c0_i32_1 = arith.constant 0 : i32
    return %c0_i32, %c0_i32_0 : i32, i32
  }
  func.func @transform_4(%arg0: i32) -> (i32, i32) {
    %c0_i32 = arith.constant 0 : i32
    %c0_i32_0 = arith.constant 0 : i32
    %c0_i32_1 = arith.constant 0 : i32
    return %c0_i32, %c0_i32_0 : i32, i32
  }
  func.func @transform_5(%arg0: i32) -> (i32, i32) {
    %c0_i32 = arith.constant 0 : i32
    %c0_i32_0 = arith.constant 0 : i32
    %c0_i32_1 = arith.constant 0 : i32
    return %c0_i32, %c0_i32_0 : i32, i32
  }
  func.func @transform_6(%arg0: i32) -> (i32, i32) {
    %c0_i32 = arith.constant 0 : i32
    %c0_i32_0 = arith.constant 0 : i32
    %c0_i32_1 = arith.constant 0 : i32
    return %c0_i32, %c0_i32_0 : i32, i32
  }
  func.func @transform_7(%arg0: i32) -> (i32, i32) {
    %c0_i32 = arith.constant 0 : i32
    %c0_i32_0 = arith.constant 0 : i32
    %c0_i32_1 = arith.constant 0 : i32
    return %c0_i32, %c0_i32_0 : i32, i32
  }
  func.func @transform_8(%arg0: i32) -> (i32, i32) {
    %c0_i32 = arith.constant 0 : i32
    %c0_i32_0 = arith.constant 0 : i32
    %c0_i32_1 = arith.constant 0 : i32
    return %c0_i32, %c0_i32_0 : i32, i32
  }
  func.func @transform_9(%arg0: i32) -> (i32, i32) {
    %c0_i32 = arith.constant 0 : i32
    %c0_i32_0 = arith.constant 0 : i32
    return %c0_i32, %arg0 : i32, i32
  }
}

</mosaic_0001>

<bundles_post_ra>
// kernel: tpu_custom_call.1
= control target key start
LH: loop header
LB: loop body
LE: loop exit
PB: predicated region body
PF: predicated region fallthrough
CT: control target
= control target key end

     0   :  { %s1214_s0 = inlined_call_operand.vmem [shape: f32[16,256], index: 0, kind: input, shape index: {}]   ;;  %s1215_s1 = inlined_call_operand.vmem [shape: bf16[32,16], index: 1, kind: input, shape index: {}]   ;;  %s1216_s2 = inlined_call_operand.vmem [shape: f32[32,1], index: 2, kind: input, shape index: {}]   ;;  %s1217_s3 = inlined_call_operand.vmem [shape: bf16[32,32], index: 3, kind: input, shape index: {}]   ;;  %s1218_s4 = inlined_call_operand.vmem [shape: f32[32,1], index: 4, kind: input, shape index: {}]   ;;  %s1219_s5 = inlined_call_operand.vmem [shape: bf16[32,32], index: 5, kind: input, shape index: {}]   ;;  %s1220_s6 = inlined_call_operand.vmem [shape: f32[32,1], index: 6, kind: input, shape index: {}]   ;;  %s1221_s7 = inlined_call_operand.vmem [shape: bf16[1,32], index: 7, kind: input, shape index: {}]   ;;  %s1222_s8 = inlined_call_operand.<no memory space> [shape: f32[1,1], index: 8, kind: input, shape index: {}]   ;;  %s1223_s9 = inlined_call_operand.hbm [shape: f32[1,256], index: 9, kind: output, shape index: {}]  }
   0x1   :  { %v14_v0 = vstv %s1222_s8 }
   0x2   :  { %15 = vst [vmem:[#allocation2] sm:$0x1] %v14_v0 }
   0x3   :  { %16 = vsyncpa [#allocation5], 0 }
   0x4   :  { %18 = vsyncpa [#allocation5 + $0x1], 0  ;;  %s1040_s11 = smov 0   ;;  %s1042_s12 = smov 0  }
   0x5   :  { %s1044_s13 = smov 0   ;;  %s1046_s14 = smov 0  }
   0x6 LB: > { %s801_s8 = sadd.s32 4294967295, %s981_s14   ;;  %s802_s15 = sadd.s32 4294967294, %s981_s14   ;;  %s981_s14 = sphi %s1046_s14, %s1229_s14   ;;  %s977_s13 = sphi %s1044_s13, %s1228_s13   ;;  %s973_s12 = sphi %s1042_s12, %s1227_s12   ;;  %s969_s11 = sphi %s1040_s11, %s1226_s11  }
   0x7   : > { %s1063_s16 = sadd.s32 1, %s981_s14   ;;  %s31_s17 = sadd.s32 1, %s977_s13 }
   0x8   : > { %s28_s18 = ssub.s32 %s981_s14, %s1063_s16  ;;  %p38_p0 = scmp.ne.s32.totalorder %s977_s13, %s973_s12 }
   0x9   : > { %p29_p1 = scmp.eq.s32.totalorder %s28_s18, 0  ;;  %p39_p2 = scmp.eq.s32.totalorder %s981_s14, 0 }
   0xa   : > { %p236_p3 = scmp.eq.s32.totalorder %s801_s8, 1  ;;  %p241_p4 = scmp.ne.s32.totalorder %s973_s12, %s969_s11 }
   0xb   : > { %s1076_s19 = scalar_select %p29_p1, %s977_s13, %s31_s17  }
   0xc   : > { %p40_p5 = por %p39_p2, %p38_p0  ;;  %p1078_p6 = por %p236_p3, %p38_p0 }
   0xd   : > { %p242_p7 = scmp.eq.s32.totalorder %s802_s15, 1  ;;  %p804_p9 = scmp.ge.s32.totalorder %s981_s14, 2 }
   0xf   : > { %p1082_p8 = por %p242_p7, %p241_p4  ;;  %282 = sbr.rel (%p804_p9) target bundleno = 29 (0x1d), region = 48 }
  0x16   : > { %285 = sbr.rel (!%p40_p5) target bundleno = 29 (0x1d), region = 52  ;;  %s287_s22 = sand.u32 (%p40_p5), 1, %s977_s13  }
  0x17   : > { %s806_s23 = sshll.u32 (%p40_p5), %s981_s14, 3  ;;  %s805_s24 = sshll.u32 (%p40_p5), %s287_s22, 4 }
  0x18   : > { %s291_s27 = scalar_lea.vmem (%p40_p5), %s1214_s0, %s806_s23  ;;  %s289_s28 = scalar_lea.vmem (%p40_p5), [#allocation3], %s805_s24 }
  0x19   : > { %v321_v1 = vld [vmem:[%s291_s27] sm:$0xff] (%p40_p5)  ;;  %v323_v2 = vld [vmem:[%s291_s27 + $0x10] sm:$0xff] (%p40_p5) }
  0x1a   : > { %322 = vst [vmem:[%s289_s28] sm:$0xff] (%p40_p5), %v321_v1  ;;  %324 = vst [vmem:[%s289_s28 + $0x8] sm:$0xff] (%p40_p5), %v323_v2 }
  0x1d PF: > { %p807_p10 = scmp.ge.s32.totalorder %s981_s14, 1  ;;  %p329_p11 = scmp.lt.s32.totalorder %s981_s14, 3 }
  0x1f   : > { %p330_p12 = pnand %p807_p10, %p329_p11 }
  0x20   : > { %s1097_s29 = sand.u32 (!%p330_p12), 1, %s973_s12   ;;  %v913_v3 = vld [vmem:[%s1215_s1] sm:$0xff] (!%p330_p12)   ;;  %vm412_vm0 = vcmask (!%p330_p12), 130048   ;;  %v983_v7 = vmov (!%p330_p12), 0   ;;  %v380_v8 = vld [vmem:[%s1216_s2 + $0x10] sm:$0xff] (!%p330_p12)  ;;  %v379_v10 = vld [vmem:[%s1216_s2 + $0x8] sm:$0xff] (!%p330_p12) }
  0x21   : > { %333 = sbr.rel (%p330_p12) target bundleno = 956 (0x3bc), region = 90  ;;  %s808_s15 = sshll.u32 (!%p330_p12), %s1097_s29, 4  ;;  %841 = vmatprep.mubr.msk.bf16.mxu0 (!%p330_p12), %vm412_vm0, %v913_v3  ;;  %v378_v4 = vld [vmem:[%s1216_s2] sm:$0xff] (!%p330_p12)  ;;  %911 = vset.pattern.permute.xlu0 (!%p330_p12), %v983_v7  ;;  %v381_v11 = vld [vmem:[%s1216_s2 + $0x18] sm:$0xff] (!%p330_p12)  ;;  %v914_v12 = vld [vmem:[%s1215_s1 + $0x8] sm:$0xff] (!%p330_p12)   ;;  %vm512_vm1 = vcmask (!%p330_p12), 261120  }
  0x22   : > { %s338_s22 = scalar_lea.vmem (!%p330_p12), [#allocation3], %s808_s15  ;;  %912 = vset.pattern.permute.xlu1 (!%p330_p12), %v983_v7  ;;  %384 = vperm.xlu0 (!%p330_p12), %911, %v378_v4   ;;  %v478_v13 = vld [vmem:[%s1218_s4] sm:$0xff] (!%p330_p12)  ;;  %v479_v14 = vld [vmem:[%s1218_s4 + $0x8] sm:$0xff] (!%p330_p12)  ;;  %v480_v15 = vld [vmem:[%s1218_s4 + $0x10] sm:$0xff] (!%p330_p12)  ;;  %v984_v62 = vmov (!%p330_p12), 0.0   ;;  %vm985_vm2 = vmmov (!%p330_p12), 0  }
  0x23   : > { %v371_v5 = vld [vmem:[%s338_s22] sm:$0xff] (!%p330_p12)  ;;  %v372_v6 = vld [vmem:[%s338_s22 + $0x8] sm:$0xff] (!%p330_p12)  ;;  %394 = vperm.xlu1 (!%p330_p12), %912, %v380_v8   ;;  %s822_s18 = sshll.u32 (!%p330_p12), %s801_s8, 4  ;;  %s369_s22 = scalar_lea.vmem (!%p330_p12), [#allocation4], %s1097_s29 }
  0x24   : > { %v373_v9 = vpack.c.bf16 (!%p330_p12), %v372_v6, %v371_v5  ;;  %v481_v16 = vld [vmem:[%s1218_s4 + $0x18] sm:$0xff] (!%p330_p12)  ;;  %v578_v17 = vld [vmem:[%s1220_s6] sm:$0xff] (!%p330_p12)  ;;  %v579_v18 = vld [vmem:[%s1220_s6 + $0x8] sm:$0xff] (!%p330_p12)  ;;  %s741_s23 = sshll.u32 (!%p330_p12), %s369_s22, 4  ;;  %s1170_s26 = scalar_lea.hbm (!%p330_p12), %s1223_s9, %s822_s18  ;;  %s1172_s23 = int_to_ptr.vmem [resolvable:$true] %s741_s23 }
  0x25   : > { %v580_v19 = vld [vmem:[%s1220_s6 + $0x10] sm:$0xff] (!%p330_p12)  ;;  %v581_v20 = vld [vmem:[%s1220_s6 + $0x18] sm:$0xff] (!%p330_p12)  ;;  %v674_v21 = vld [vmem:[#allocation2] sm:$0x1] (!%p330_p12)  ;;  %s729_s8 = scalar_lea.sflag (!%p330_p12), [#allocation5], %s1097_s29  ;;  %s919_s27 = scalar_lea.vmem (!%p330_p12), %s1172_s23, 16 }
  0x26   : > { %839 = vmatprep.subr.bf16.mxu0 (!%p330_p12), %v373_v9  ;;  %389 = vperm.xlu0 (!%p330_p12), %911, %v379_v10   ;;  %v915_v22 = vld [vmem:[%s1217_s3] sm:$0xff] (!%p330_p12)   ;;  %v916_v41 = vld [vmem:[%s1217_s3 + $0x8] sm:$0xff] (!%p330_p12)   ;;  %p920_p13 = scmp.ne.s32.totalorder (!%p330_p12), %s1172_s23, %s919_s27  ;;  %s986_s28 = smov (!%p330_p12), [#allocation4]  }
  0x27   : > { %840 = vmatpush3.bf16.msra.mxu0 (!%p330_p12), %v373_v9  ;;  %399 = vperm.xlu1 (!%p330_p12), %912, %v381_v11   ;;  %v917_v42 = vld [vmem:[%s1219_s5] sm:$0xff] (!%p330_p12)   ;;  %v918_v61 = vld [vmem:[%s1219_s5 + $0x8] sm:$0xff] (!%p330_p12)   ;;  %s923_s30 = sshll.u32 (!%p330_p12), %s986_s28, 4  ;;  %s924_s30 = int_to_ptr.vmem [resolvable:$false] %s923_s30 }
  0x28   : > { %849 = vmatprep.mubr.msk.bf16.mxu1 %vm512_vm1, %v915_v22  ;;  %p921_p0 = pnand %p920_p13, %p1078_p6  ;;  %s925_s10 = scalar_lea.vmem %s924_s30, 32 }
  0x29   : > { %p926_p2 = scmp.lt.s32.totalorder %s1172_s23, %s924_s30  ;;  %p927_p3 = scmp.lt.s32.totalorder %s925_s10, %s919_s27 }
  0x2a   : > { %842 = vmatmul.mubr.msk.bf16.vlgmr.msra.gmra.mrb[0].mxu0 %vm412_vm0, %v914_v12  ;;  %484 = vperm.xlu0 %911, %v478_v13   ;;  %p922_p1 = pneg %p921_p0 }
  0x2b   : > { %489 = vperm.xlu1 %912, %v479_v14   ;;  %857 = vmatprep.mubr.msk.bf16.mxu0 %vm512_vm1, %v917_v42  ;;  %p928_p4 = por %p927_p3, %p926_p2 }
  0x2d   : > { %p929_p5 = pnand %p928_p4, %p922_p1 }
  0x2e   : > { %494 = vperm.xlu0 %911, %v480_v15  }
  0x2f   : > { %499 = vperm.xlu1 %912, %v481_v16  }
  0x32   : > { %584 = vperm.xlu0 %911, %v578_v17   ;;  %v673_v17 = vld [vmem:[%s1221_s7] sm:$0x1] }
  0x33   : > { %589 = vperm.xlu1 %912, %v579_v18   ;;  %v680_v18 = vlaneseq }
  0x36   : > { %594 = vperm.xlu0 %911, %v580_v19   ;;  %v681_v19 = vshrl.u32 %v680_v18, 7 }
  0x37   : > { %599 = vperm.xlu1 %912, %v581_v20  }
  0x38   : > { %v682_v20 = vsub.s32 0, %v681_v19 }
  0x3a   : > { %677 = vperm.xlu0 %911, %v674_v21  }
  0xa1   : > { %v385_v24 = vpop.permute.xlu0 %384 }
  0xa2   : > { %v395_v23 = vpop.permute.xlu1 %394 }
  0xa5   : > { %v390_v31 = vpop.permute.xlu0 %389 }
  0xa6   : > { %v400_v28 = vpop.permute.xlu1 %399 }
  0xa9   : > { %v485_v43 = vpop.permute.xlu0 %484 }
  0xaa   : > { %v490_v44 = vpop.permute.xlu1 %489 }
  0xad   : > { %v495_v45 = vpop.permute.xlu0 %494 }
  0xae   : > { %v500_v49 = vpop.permute.xlu1 %499 }
  0xb1   : > { %v585_v63 = vpop.permute.xlu0 %584 }
  0xb2   : > { %v590_v0 = vpop.permute.xlu1 %589 }
  0xb5   : > { %v595_v1 = vpop.permute.xlu0 %594 }
  0xb6   : > { %v600_v5 = vpop.permute.xlu1 %599 }
  0xb9   : > { %v678_v21 = vpop.permute.xlu0 %677 }
  0xba   : > { %v683_v22 = vrot.slane %v678_v21, %v682_v20 }
  0xfd   : > { %v843_v25 = vpop.f32.mrb[0].mxu0 }
  0xfe   : > { %v462_v26 = vadd.f32 %v843_v25, %v395_v23  ;;  %v453_v27 = vpop.f32.mrb[1].mxu0 }
  0xff   : > { %v454_v29 = vadd.f32 %v453_v27, %v385_v24  ;;  %v844_v30 = vpop.f32.mrb[2].mxu0 }
 0x100   : > { %v465_v32 = vadd.f32 %v844_v30, %v400_v28  ;;  %v456_v33 = vpop.f32.mrb[3].mxu0  ;;  %v470_v35 = vmax.f32 %v462_v26, 0.0 }
 0x101   : > { %v457_v34 = vadd.f32 %v456_v33, %v390_v31  ;;  %v468_v37 = vmax.f32 %v454_v29, 0.0 }
 0x102   : > { %v471_v36 = vmax.f32 %v465_v32, 0.0 }
 0x103   : > { %v469_v38 = vmax.f32 %v457_v34, 0.0 }
 0x104   : > { %v473_v39 = vpack.c.bf16 %v471_v36, %v470_v35 }
 0x105   : > { %v472_v40 = vpack.c.bf16 %v469_v38, %v468_v37 }
 0x107   : > { %845 = vmatprep.subr.bf16.mxu1 %v472_v40 }
 0x108   : > { %846 = vmatpush3.bf16.msra.mxu1 %v472_v40 }
 0x109   : > { %847 = vmatprep.subr.bf16.mxu1 %v473_v39 }
 0x10c   : > { %848 = vmatpush3.bf16.msra.mxu1 %v473_v39 }
 0x10d   : > { %861 = vmatprep.subr.bf16.mxu1 %v984_v62 }
 0x10f   : > { %850 = vmatmul.mubr.msk.bf16.vlgmr.msra.gmra.mrb[0].mxu1 %vm512_vm1, %v916_v41 }
 0x110   : > { %865 = vmatprep.mubr.msk.bf16.mxu1 %vm985_vm2, %v984_v62 }
 0x1e2   : > { %v851_v46 = vpop.f32.mrb[0].mxu1 }
 0x1e3   : > { %v562_v47 = vadd.f32 %v851_v46, %v495_v45  ;;  %v553_v48 = vpop.f32.mrb[1].mxu1 }
 0x1e4   : > { %v554_v50 = vadd.f32 %v553_v48, %v485_v43  ;;  %v852_v51 = vpop.f32.mrb[2].mxu1 }
 0x1e5   : > { %v565_v52 = vadd.f32 %v852_v51, %v500_v49  ;;  %v556_v53 = vpop.f32.mrb[3].mxu1  ;;  %v570_v55 = vmax.f32 %v562_v47, 0.0 }
 0x1e6   : > { %v557_v54 = vadd.f32 %v556_v53, %v490_v44  ;;  %v568_v57 = vmax.f32 %v554_v50, 0.0 }
 0x1e7   : > { %v571_v56 = vmax.f32 %v565_v52, 0.0 }
 0x1e8   : > { %v569_v58 = vmax.f32 %v557_v54, 0.0 }
 0x1e9   : > { %v573_v59 = vpack.c.bf16 %v571_v56, %v570_v55 }
 0x1ea   : > { %v572_v60 = vpack.c.bf16 %v569_v58, %v568_v57 }
 0x1ec   : > { %853 = vmatprep.subr.bf16.mxu0 %v572_v60 }
 0x1ed   : > { %854 = vmatpush3.bf16.msra.mxu0 %v572_v60 }
 0x1ee   : > { %855 = vmatprep.subr.bf16.mxu0 %v573_v59 }
 0x1f1   : > { %856 = vmatpush3.bf16.msra.mxu0 %v573_v59 }
 0x1f4   : > { %858 = vmatmul.mubr.msk.bf16.vlgmr.msra.gmra.mrb[4].mxu0 %vm512_vm1, %v918_v61 }
 0x2c7   : > { %v859_v2 = vpop.f32.mrb[4].mxu0 }
 0x2c8   : > { %v661_v3 = vadd.f32 %v859_v2, %v595_v1  ;;  %v652_v4 = vpop.f32.mrb[5].mxu0 }
 0x2c9   : > { %v653_v6 = vadd.f32 %v652_v4, %v585_v63  ;;  %v860_v7 = vpop.f32.mrb[6].mxu0 }
 0x2ca   : > { %v664_v8 = vadd.f32 %v860_v7, %v600_v5  ;;  %v655_v9 = vpop.f32.mrb[7].mxu0  ;;  %v669_v11 = vmax.f32 %v661_v3, 0.0 }
 0x2cb   : > { %v656_v10 = vadd.f32 %v655_v9, %v590_v0  ;;  %v667_v13 = vmax.f32 %v653_v6, 0.0 }
 0x2cc   : > { %v670_v12 = vmax.f32 %v664_v8, 0.0 }
 0x2cd   : > { %v668_v14 = vmax.f32 %v656_v10, 0.0 }
 0x2ce   : > { %v672_v15 = vpack.c.bf16 %v670_v12, %v669_v11 }
 0x2cf   : > { %v671_v16 = vpack.c.bf16 %v668_v14, %v667_v13 }
 0x2d1   : > { %862 = vmatpush3.bf16.msra.mxu1 %v671_v16 }
 0x2d2   : > { %863 = vmatprep.subr.bf16.mxu1 %v984_v62 }
 0x2d5   : > { %864 = vmatpush3.bf16.msra.mxu1 %v672_v15 }
 0x2d8   : > { %866 = vmatmul.mubr.msk.bf16.vlgmr.msra.gmra.mrb[4].mxu1 %vm512_vm1, %v673_v17 }
 0x3ab   : > { %v721_v23 = vpop.f32.mrb[4].mxu1 }
 0x3ac   : > { %v722_v24 = vadd.f32 %v721_v23, %v683_v22  ;;  %v867_v25 = vpop.f32.mrb[5].mxu1 }
 0x3ad   : > { %v724_v26 = vpop.f32.mrb[6].mxu1 }
 0x3ae   : > { %727 = vst [vmem:[%s369_s22] sm:$0x1] %v722_v24  ;;  %v868_v27 = vpop.f32.mrb[7].mxu1 }
 0x3af   : > { %932 = shalt.err (!%p929_p5)
}
 0x3b0   : > { %s933_s29 = scalar_lea.hbm %s1170_s26, 16  ;;  %s937_s18 = scalar_lea.hbm %s1223_s9, 32 }
 0x3b1   : > { %p934_p7 = scmp.ne.s32.totalorder %s1170_s26, %s933_s29  ;;  %p938_p12 = scmp.lt.u32.totalorder %s1170_s26, %s1223_s9 }
 0x3b2   : > { %p939_p13 = scmp.lt.u32.totalorder %s937_s18, %s933_s29  ;;  %p941_p1 = scmp.lt.u32.totalorder %s933_s29, %s1170_s26 }
 0x3b3   : > { %p935_p10 = pnand %p934_p7, %p1078_p6 }
 0x3b4   : > { %p940_p0 = por %p939_p13, %p938_p12 }
 0x3b5   : > { %p936_p11 = pneg %p935_p10 }
 0x3b6   : > { %p942_p2 = por %p941_p1, %p940_p0 }
 0x3b8   : > { %p943_p3 = pnand %p942_p2, %p936_p11 }
 0x3ba   : > { %946 = shalt.err (!%p943_p3)
}
 0x3bb   : > { %869 = dma.vmem_to_hbm [thread:$0]  (%p1078_p6), %s1172_s23, 16, %s1170_s26, %s729_s8  }
 0x3bc PF: > { %s753_s25 = sand.u32 1, %s969_s11   ;;  %p872_p4 = pnand %p804_p9, %p1082_p8 }
 0x3bd   : > { %s754_s27 = scalar_lea.sflag [#allocation5], %s753_s25 }
 0x3be   : > { %964 = dma.done.wait (!%p872_p4), %s754_s27, 16  }
 0x3bf   : > { %966 = vsyncadd (!%p872_p4), %s754_s27, 4294967280  ;;  %p21_p5 = scmp.ge.s32.totalorder %s1063_s16, 4   ;;  %s1226_s11 = smov %s973_s12 }
 0x3c0   : > { %s1227_s12 = smov %s977_s13  ;;  %s1228_s13 = smov %s1076_s19 }
 0x3c1   : > { %s1229_s14 = smov %s1063_s16  ;;  %23 = sbr.rel (!%p21_p5) target bundleno = 6 (0x6), region = 134 }
 0x3c8   :  { %758 = vsyncpa [#allocation5], 1 }
 0x3c9   :  { %760 = vsyncpa [#allocation5 + $0x1], 1 }

</bundles_post_ra>
